<compile_context>
chip_gen: v5e
topology: v5e:2x2
jax: 0.10.0
libtpu: 0.0.40
codegen_flags: <defaults>
</compile_context>

<pallas_src>
import functools

import jax
import jax.numpy as jnp
from jax.experimental import pallas as pl
from jax.experimental.pallas import tpu as pltpu


_MAX_TILE_ELEMS = 1 << 19   # 512K f32 elements = 2 MiB per buffer


def _pick_row_tile(rows: int, cols: int, max_elems: int = _MAX_TILE_ELEMS) -> int:
    """Largest row tile (multiple of 8, dividing `rows`) within the VMEM budget."""
    if rows * cols <= max_elems or rows <= 8:
        return rows
    cap = max(8, (max_elems // max(cols, 1)) // 8 * 8)
    t = min(cap, (rows // 8) * 8)
    while t >= 8:
        if rows % t == 0:
            return t
        t -= 8
    return rows   # no aligned divisor: fall back to a single block


def _elementwise_2d(total: int) -> tuple[int, int]:
    """2D shape for pure-elementwise work with a lane-dense (multiple-of-128) last dim."""
    for lanes in (8192, 4096, 2048, 1024, 512, 256, 128):
        if total % lanes == 0:
            return total // lanes, lanes
    return 1, total   # small / odd sizes: single row, full extent


# ----------------------------- kernel bodies ------------------------------- #

def _layernorm_kernel(x_ref, o_ref, *, eps: float, d: int):
    x = x_ref[...]                                            # (tile_rows, D)
    mean = jnp.mean(x, axis=-1, keepdims=True)
    xc = x - mean
    var = jnp.sum(xc * xc, axis=-1, keepdims=True) * (1.0 / (d - 1))  # unbiased (torch.std)
    std = jnp.sqrt(var)
    o_ref[...] = xc / (std + eps)                             # a = 1, b = 0 in the module


def _residual_kernel(x_ref, sub_ref, o_ref):
    o_ref[...] = x_ref[...] + sub_ref[...]


def _residual_dropout_kernel(x_ref, sub_ref, mask_ref, o_ref):
    # mask is pre-scaled: 0 where dropped, 1/(1-p) where kept (inverted dropout)
    o_ref[...] = x_ref[...] + sub_ref[...] * mask_ref[...]


# ------------------------------- wrappers ----------------------------------- #

def layer_norm(x2: jnp.ndarray, *, eps: float = 1e-6) -> jnp.ndarray:
    """Torch-style LayerNorm (unbiased std, eps added to std) on a (rows, D) array."""
    rows, d = x2.shape
    tr = _pick_row_tile(rows, d)
    grid = (rows // tr,)
    kernel = functools.partial(_layernorm_kernel, eps=eps, d=d)
    return pl.pallas_call(
        kernel,
        out_shape=jax.ShapeDtypeStruct((rows, d), x2.dtype),
        grid=grid,
        in_specs=[pl.BlockSpec((tr, d), lambda i: (i, 0))],
        out_specs=pl.BlockSpec((tr, d), lambda i: (i, 0)),
        compiler_params=pltpu.CompilerParams(dimension_semantics=("parallel",)),
        cost_estimate=pl.CostEstimate(
            flops=6 * rows * d, transcendentals=0,
            bytes_accessed=2 * rows * d * x2.dtype.itemsize),
    )(x2)


def _residual_add(x2: jnp.ndarray, sub2: jnp.ndarray, mask2=None) -> jnp.ndarray:
    """x + sub  (optionally  x + sub * mask), on a lane-dense 2D reshape."""
    total = x2.size
    r, c = _elementwise_2d(total)
    xf, sf = x2.reshape(r, c), sub2.reshape(r, c)
    tr = _pick_row_tile(r, c)
    grid = (r // tr,)
    spec = pl.BlockSpec((tr, c), lambda i: (i, 0))
    nbytes = x2.dtype.itemsize
    cparams = pltpu.CompilerParams(dimension_semantics=("parallel",))

    if mask2 is None:
        out = pl.pallas_call(
            _residual_kernel,
            out_shape=jax.ShapeDtypeStruct((r, c), x2.dtype),
            grid=grid, in_specs=[spec, spec], out_specs=spec,
            compiler_params=cparams,
            cost_estimate=pl.CostEstimate(flops=total, transcendentals=0,
                                          bytes_accessed=3 * total * nbytes),
        )(xf, sf)
    else:
        mf = mask2.reshape(r, c)
        out = pl.pallas_call(
            _residual_dropout_kernel,
            out_shape=jax.ShapeDtypeStruct((r, c), x2.dtype),
            grid=grid, in_specs=[spec, spec, spec], out_specs=spec,
            compiler_params=cparams,
            cost_estimate=pl.CostEstimate(flops=2 * total, transcendentals=0,
                                          bytes_accessed=4 * total * nbytes),
        )(xf, sf, mf)
    return out.reshape(x2.shape)


def sublayer_connection(x, sublayer_fn, *, p_drop: float = 0.1, training: bool = False,
                        dropout_key=None, eps: float = 1e-6):
    """Forward of SublayerConnection:  x + dropout(sublayer(LayerNorm(x)))."""
    orig_shape = x.shape
    d = orig_shape[-1]
    x2 = x.reshape(-1, d)

    normed = layer_norm(x2, eps=eps).reshape(orig_shape)

    # TODO(synk): `sublayer` is an arbitrary nn.Module passed at call time; it is applied
    # here as a plain JAX callable between the two Pallas kernels (no Pallas equivalent).
    sub = sublayer_fn(normed)

    if training and p_drop > 0.0:
        if dropout_key is None:
            dropout_key = jax.random.PRNGKey(0)
        keep = jax.random.bernoulli(dropout_key, 1.0 - p_drop, shape=orig_shape)
        mask = keep.astype(x.dtype) * (1.0 / (1.0 - p_drop))   # pre-scaled inverted-dropout mask
        out2 = _residual_add(x2, sub.reshape(-1, d), mask.reshape(-1, d))
    else:
        out2 = _residual_add(x2, sub.reshape(-1, d))
    return out2.reshape(orig_shape)


if __name__ == "__main__":
    key = jax.random.PRNGKey(0)
    kx, kw, kd = jax.random.split(key, 3)

    B, S, D = 2, 8, 32           # batch, seq, hidden ("size" of the module)
    x = jax.random.normal(kx, (B, S, D), dtype=jnp.float32)
    w = jax.random.normal(kw, (D, D), dtype=jnp.float32) / jnp.sqrt(D)
    sublayer = lambda h: h @ w   # stand-in for the arbitrary sublayer module

    # ---- eval mode (dropout = identity) ----
    y = sublayer_connection(x, sublayer, p_drop=0.1, training=False)
    y = jax.block_until_ready(y)

    mean = x.mean(-1, keepdims=True)
    std = jnp.std(x, axis=-1, ddof=1, keepdims=True)          # torch.std default: unbiased
    normed_ref = (x - mean) / (std + 1e-6)
    y_ref = x + sublayer(normed_ref)
    assert jnp.allclose(y, y_ref, atol=1e-5, rtol=1e-5), "eval-path mismatch vs reference"

    # ---- training mode (explicit mask -> exactly reproducible) ----
    y_tr = sublayer_connection(x, sublayer, p_drop=0.1, training=True, dropout_key=kd)
    y_tr = jax.block_until_ready(y_tr)

    keep = jax.random.bernoulli(kd, 0.9, shape=(B, S, D))
    mask = keep.astype(jnp.float32) * (1.0 / 0.9)
    y_tr_ref = x + sublayer(normed_ref) * mask
    assert jnp.allclose(y_tr, y_tr_ref, atol=1e-5, rtol=1e-5), "train-path mismatch vs reference"

    print("KERNEL_OK")
</pallas_src>

<mosaic_0001>
module attributes {stable_mosaic.version = 11 : i64} {
  func.func @_layernorm_kernel(%arg0: i32, %arg1: memref<16x32xf32, #tpu.memory_space<vmem>>, %arg2: memref<16x32xf32, #tpu.memory_space<vmem>>) attributes {dimension_semantics = [#tpu.dimension_semantics<parallel>], iteration_bounds = array<i64: 1>, scalar_prefetch = 0 : i64, scratch_operands = 0 : i64, tpu.core_type = #tpu.core_type<tc>, window_params = [{transform_indices = @transform_0, window_bounds = array<i64: 16, 32>}, {transform_indices = @transform_1, window_bounds = array<i64: 16, 32>}]} {
    %c0 = arith.constant 0 : index
    %c0_0 = arith.constant 0 : index
    %0 = vector.load %arg1[%c0, %c0_0] : memref<16x32xf32, #tpu.memory_space<vmem>>, vector<16x32xf32>
    %cst = arith.constant dense<0.000000e+00> : vector<16xf32>
    %1 = vector.multi_reduction <add>, %0, %cst [1] : vector<16x32xf32> to vector<16xf32>
    %2 = vector.shape_cast %1 : vector<16xf32> to vector<16x1xf32>
    %cst_1 = arith.constant 3.200000e+01 : f32
    %3 = vector.broadcast %cst_1 : f32 to vector<16x1xf32>
    %4 = arith.divf %2, %3 : vector<16x1xf32>
    %5 = vector.broadcast %4 : vector<16x1xf32> to vector<16x32xf32>
    %6 = arith.subf %0, %5 : vector<16x32xf32>
    %7 = arith.mulf %6, %6 : vector<16x32xf32>
    %cst_2 = arith.constant dense<0.000000e+00> : vector<16xf32>
    %8 = vector.multi_reduction <add>, %7, %cst_2 [1] : vector<16x32xf32> to vector<16xf32>
    %9 = vector.shape_cast %8 : vector<16xf32> to vector<16x1xf32>
    %cst_3 = arith.constant 0.0322580636 : f32
    %10 = vector.broadcast %cst_3 : f32 to vector<16x1xf32>
    %11 = arith.mulf %9, %10 : vector<16x1xf32>
    %12 = math.sqrt %11 : vector<16x1xf32>
    %cst_4 = arith.constant 9.99999997E-7 : f32
    %13 = vector.broadcast %cst_4 : f32 to vector<16x1xf32>
    %14 = arith.addf %12, %13 : vector<16x1xf32>
    %15 = vector.broadcast %14 : vector<16x1xf32> to vector<16x32xf32>
    %16 = arith.divf %6, %15 : vector<16x32xf32>
    %c0_5 = arith.constant 0 : index
    %c0_6 = arith.constant 0 : index
    %17 = vector.load %arg2[%c0_5, %c0_6] : memref<16x32xf32, #tpu.memory_space<vmem>>, vector<16x32xf32>
    tpu.vector_store %arg2[%c0_5, %c0_6], %16 {strides = array<i32>} : memref<16x32xf32, #tpu.memory_space<vmem>>, vector<16x32xf32>,
    return
  }
  func.func @transform_0(%arg0: i32) -> (i32, i32) {
    %c0_i32 = arith.constant 0 : i32
    %c0_i32_0 = arith.constant 0 : i32
    return %arg0, %c0_i32 : i32, i32
  }
  func.func @transform_1(%arg0: i32) -> (i32, i32) {
    %c0_i32 = arith.constant 0 : i32
    %c0_i32_0 = arith.constant 0 : i32
    return %arg0, %c0_i32 : i32, i32
  }
}

</mosaic_0001>

<bundles_post_ra>
// kernel: tpu_custom_call.1
= control target key start
LH: loop header
LB: loop body
LE: loop exit
PB: predicated region body
PF: predicated region fallthrough
CT: control target
= control target key end

     0   :  { %6 = vsyncpa [#allocation3], 0  ;;  %s237_s0 = inlined_call_operand.hbm [shape: f32[16,32], index: 0, kind: input, shape index: {}]   ;;  %s238_s1 = inlined_call_operand.hbm [shape: f32[16,32], index: 1, kind: output, shape index: {}]  }
   0x1   :  { %7 = vsyncpa [#allocation4], 0  ;;  %s12_s8 = sshll.u32 %s237_s0, 4  ;;  %s199_s9 = smov [#allocation2]   ;;  %s13_s8 = int_to_ptr.hbm [resolvable:$true] %s12_s8 }
   0x2   :  { %s14_s10 = sshll.u32 %s199_s9, 4  ;;  %s200_s11 = smov 128   ;;  %s15_s10 = int_to_ptr.vmem [resolvable:$true] %s14_s10 }
   0x3   :  { %s201_s12 = smov 8  }
   0x4   :  { %20 = dma.hbm_to_vmem [thread:$0]  %s13_s8, 256, %s15_s10, [#allocation3], %s200_s11, %s200_s11, %s201_s12  }
   0x5   :  { %195 = dma.done.wait [#allocation3], 256  }
   0x6   :  { %196 = vsyncadd [#allocation3], 4294967040  ;;  %vm27_vm0 = vcmask 261120   ;;  %v25_v0 = vld [vmem:[#allocation2] sm:$0xff]  ;;  %v26_v2 = vld [vmem:[#allocation2 + $0x8] sm:$0xff]  ;;  %v202_v4 = vmov 32.0  }
   0x7   :  { %v28_v1 = vsel %vm27_vm0, %v25_v0, 0.0  ;;  %v31_v3 = vsel %vm27_vm0, %v26_v2, 0.0  ;;  %137 = vrcp.f32 %v202_v4  ;;  %s203_s0 = smov [#allocation5]   ;;  %s119_s16 = sshll.u32 %s238_s1, 4  ;;  %s120_s16 = int_to_ptr.hbm [resolvable:$true] %s119_s16 }
   0x8   :  { %29 = vadd.xlane.f32.xlu0 %v28_v1  ;;  %s117_s13 = sshll.u32 %s203_s0, 4  ;;  %s118_s13 = int_to_ptr.vmem [resolvable:$true] %s117_s13 }
   0xd   :  { %v138_v5 = vpop.eup %137 }
   0xe   :  { %v35_v6 = vmul.f32 32.0, %v138_v5  ;;  %vm39_vm1 = vweird.f32 %v138_v5 }
  0x10   :  { %32 = vadd.xlane.f32.xlu0 %v31_v3  ;;  %v36_v7 = vsub.f32 1.0, %v35_v6 }
  0x12   :  { %v37_v8 = vmul.f32 %v138_v5, %v36_v7 }
  0x14   :  { %v38_v9 = vadd.f32 %v138_v5, %v37_v8 }
  0x16   :  { %v40_v10 = vsel %vm39_vm1, %v138_v5, %v38_v9 }
  0x7b   :  { %v30_v11 = vpop.xlane.xlu0 %29 }
  0x7c   :  { %v41_v12 = vmul.f32 %v40_v10, %v30_v11 }
  0x7e   :  { %v43_v13 = vsub.f32 %v25_v0, %v41_v12 }
  0x80   :  { %v45_v14 = vmul.f32 %v43_v13, %v43_v13 }
  0x82   :  { %v47_v15 = vsel %vm27_vm0, %v45_v14, 0.0 }
  0x83   :  { %48 = vadd.xlane.f32.xlu1 %v47_v15  ;;  %v33_v16 = vpop.xlane.xlu0 %32 }
  0x84   :  { %v42_v17 = vmul.f32 %v40_v10, %v33_v16 }
  0x86   :  { %v223_v18 = vsub.f32 %v26_v2, %v42_v17 }
  0x88   :  { %v46_v19 = vmul.f32 %v223_v18, %v223_v18 }
  0x8a   :  { %v50_v20 = vsel %vm27_vm0, %v46_v19, 0.0 }
  0x8b   :  { %51 = vadd.xlane.f32.xlu1 %v50_v20 }
  0xf6   :  { %v49_v21 = vpop.xlane.xlu1 %48 }
  0xf7   :  { %v53_v22 = vmul.f32 0.032258064, %v49_v21 }
  0xf9   :  { %139 = vrsqrt.f32 %v53_v22  ;;  %vm62_vm2 = vcmp.eq.f32.partialorder %v53_v22, inf  ;;  %v65_v35 = vand.u32 2147483648, %v53_v22  ;;  %vm64_vm3 = vcmp.eq.f32.partialorder %v53_v22, 0.0 }
  0xfe   :  { %v52_v23 = vpop.xlane.xlu1 %51 }
  0xff   :  { %v140_v24 = vpop.eup %139  ;;  %v54_v25 = vmul.f32 0.032258064, %v52_v23 }
 0x100   :  { %v56_v26 = vmul.f32 %v140_v24, %v53_v22 }
 0x101   :  { %141 = vrsqrt.f32 %v54_v25  ;;  %vm74_vm4 = vcmp.eq.f32.partialorder %v54_v25, inf  ;;  %v77_v43 = vand.u32 2147483648, %v54_v25  ;;  %vm76_vm5 = vcmp.eq.f32.partialorder %v54_v25, 0.0 }
 0x102   :  { %v57_v27 = vmul.f32 %v140_v24, %v56_v26 }
 0x104   :  { %v58_v28 = vmul.f32 0.5, %v57_v27 }
 0x106   :  { %v59_v29 = vsub.f32 1.5, %v58_v28 }
 0x107   :  { %v142_v30 = vpop.eup %141 }
 0x108   :  { %v60_v31 = vmul.f32 %v140_v24, %v59_v29  ;;  %v68_v32 = vmul.f32 %v142_v30, %v54_v25 }
 0x10a   :  { %v61_v33 = vmul.f32 %v60_v31, %v53_v22  ;;  %v69_v34 = vmul.f32 %v142_v30, %v68_v32 }
 0x10c   :  { %v63_v36 = vsel %vm62_vm2, %v53_v22, %v61_v33  ;;  %v70_v37 = vmul.f32 0.5, %v69_v34 }
 0x10d   :  { %v66_v38 = vsel %vm64_vm3, %v65_v35, %v63_v36 }
 0x10e   :  { %v71_v39 = vsub.f32 1.5, %v70_v37  ;;  %v79_v40 = vadd.f32 1e-06, %v66_v38 }
 0x110   :  { %v72_v41 = vmul.f32 %v142_v30, %v71_v39  ;;  %143 = vrcp.f32 %v79_v40  ;;  %v92_v50 = vand.u32 2147483648, %v79_v40  ;;  %v90_v52 = vand.u32 2147483647, %v79_v40 }
 0x111   :  { %vm86_vm7 = vweird.f32 %v79_v40 }
 0x112   :  { %v73_v42 = vmul.f32 %v72_v41, %v54_v25  ;;  %v93_v55 = vor.u32 1.1754944e-38, %v92_v50  ;;  %vm91_vm9 = vcmp.eq.f32.partialorder %v90_v52, 8.507059e+37 }
 0x114   :  { %v75_v44 = vsel %vm74_vm4, %v54_v25, %v73_v42 }
 0x115   :  { %v78_v45 = vsel %vm76_vm5, %v77_v43, %v75_v44 }
 0x116   :  { %v144_v46 = vpop.eup %143  ;;  %v80_v47 = vadd.f32 1e-06, %v78_v45 }
 0x117   :  { %v82_v48 = vmul.f32 %v144_v46, %v79_v40  ;;  %vm87_vm6 = vweird.f32 %v144_v46 }
 0x118   :  { %145 = vrcp.f32 %v80_v47  ;;  %vm88_vm8 = vmor %vm86_vm7, %vm87_vm6  ;;  %v107_v61 = vand.u32 2147483648, %v80_v47  ;;  %v105_v63 = vand.u32 2147483647, %v80_v47  ;;  %vm101_vm11 = vweird.f32 %v80_v47 }
 0x119   :  { %v83_v49 = vsub.f32 1.0, %v82_v48 }
 0x11a   :  { %v108_v1 = vor.u32 1.1754944e-38, %v107_v61  ;;  %vm106_vm13 = vcmp.eq.f32.partialorder %v105_v63, 8.507059e+37 }
 0x11b   :  { %v84_v51 = vmul.f32 %v144_v46, %v83_v49 }
 0x11d   :  { %v85_v53 = vadd.f32 %v144_v46, %v84_v51 }
 0x11e   :  { %v146_v54 = vpop.eup %145 }
 0x11f   :  { %v89_v56 = vsel %vm88_vm8, %v144_v46, %v85_v53  ;;  %v97_v57 = vmul.f32 %v146_v54, %v80_v47  ;;  %vm102_vm10 = vweird.f32 %v146_v54 }
 0x120   :  { %v94_v58 = vsel %vm91_vm9, %v93_v55, %v89_v56  ;;  %vm103_vm12 = vmor %vm101_vm11, %vm102_vm10 }
 0x121   :  { %v95_v59 = vmul.f32 %v94_v58, %v43_v13  ;;  %v98_v60 = vsub.f32 1.0, %v97_v57 }
 0x123   :  { %v99_v62 = vmul.f32 %v146_v54, %v98_v60  ;;  %111 = vst.msk [vmem:[#allocation5] sm:$0xff] %vm27_vm0, %v95_v59 }
 0x125   :  { %v100_v0 = vadd.f32 %v146_v54, %v99_v62 }
 0x127   :  { %v104_v2 = vsel %vm103_vm12, %v146_v54, %v100_v0 }
 0x128   :  { %v109_v3 = vsel %vm106_vm13, %v108_v1, %v104_v2 }
 0x129   :  { %v110_v4 = vmul.f32 %v109_v3, %v223_v18 }
 0x12b   :  { %112 = vst.msk [vmem:[#allocation5 + $0x8] sm:$0xff] %vm27_vm0, %v110_v4 }
 0x12c   :  { %125 = dma.vmem_to_hbm [thread:$0]  %s118_s13, 256, %s120_s16, [#allocation4], %s200_s11, %s200_s11, %s201_s12  }
 0x12d   :  { %197 = dma.done.wait [#allocation4], 256  }
 0x12e   :  { %198 = vsyncadd [#allocation4], 4294967040 }
 0x12f   :  { %130 = vsyncpa [#allocation3], 1 }
 0x130   :  { %131 = vsyncpa [#allocation4], 1 }

</bundles_post_ra>
